<compile_context>
chip_gen: v7x
topology: tpu7x:2x2x1
jax: 0.10.0
libtpu: 0.0.40
codegen_flags: <defaults>
</compile_context>

<pallas_src>
import functools

import jax
import jax.numpy as jnp
from jax import lax
from jax.experimental import pallas as pl
from jax.experimental.pallas import tpu as pltpu

_LANES = 128
_MAX_BLOCK_ROWS = 512            # 512*128*4B = 256 KiB per input block
_THRESHOLDS = (0.55, 0.6, 0.65, 0.7, 0.75, 0.8, 0.85, 0.9, 0.95)


def _dice_sums_kernel(p_ref, t_ref, out_ref):
    """Reduce one (block_rows, 128) tile to partial sums packed in one lane-dense row."""
    x = p_ref[...]                       # (block_rows, 128) f32 logits
    y = t_ref[...]                       # (block_rows, 128) f32 targets (0/1)

    # Numerically stable sigmoid; exact 0 for the -1e9 padding logits.
    ex = jnp.exp(-jnp.abs(x))
    sig = jnp.where(x >= 0.0, 1.0 / (1.0 + ex), ex / (1.0 + ex))

    inter = jnp.sum(sig * y)             # sum(sigmoid(pred) * tgt)
    psum = jnp.sum(sig)                  # sum(sigmoid(pred))
    tsum = jnp.sum(y)                    # sum(tgt)

    # Pack the three partial sums into lanes 0..2 of a full 128-lane row so the
    # store is an unmasked lane-dense vst.
    lane = lax.broadcasted_iota(jnp.int32, out_ref.shape, 1)
    out_ref[...] = jnp.where(
        lane == 0, inter,
        jnp.where(lane == 1, psum, jnp.where(lane == 2, tsum, 0.0)))


def _dice_partial_sums(p2, t2, block_rows, n_blocks):
    return pl.pallas_call(
        _dice_sums_kernel,
        out_shape=jax.ShapeDtypeStruct((n_blocks, _LANES), jnp.float32),
        grid=(n_blocks,),
        in_specs=[
            pl.BlockSpec((block_rows, _LANES), lambda i: (i, 0)),
            pl.BlockSpec((block_rows, _LANES), lambda i: (i, 0)),
        ],
        out_specs=pl.BlockSpec((1, _LANES), lambda i: (i, 0)),
        compiler_params=pltpu.CompilerParams(
            dimension_semantics=("parallel",)),
    )(p2, t2)


@functools.partial(jax.jit, static_argnames=())
def map_loss2(prediction, target):
    """JAX/Pallas equivalent of mAPLoss2.forward(prediction, target)."""
    p = prediction.reshape(-1).astype(jnp.float32)
    t = target.reshape(-1).astype(jnp.float32)
    total = p.shape[0]

    # Lane-dense (rows, 128) layout, rows padded to a multiple of 8 per block.
    rows_total = pl.cdiv(total, _LANES)
    block_rows = min(_MAX_BLOCK_ROWS, max(8, ((rows_total + 7) // 8) * 8))
    n_blocks = max(1, pl.cdiv(rows_total, block_rows))
    padded = n_blocks * block_rows * _LANES
    pad = padded - total
    if pad:
        # sigmoid(-1e9) == 0 exactly (stable form), so padding adds nothing.
        p = jnp.pad(p, (0, pad), constant_values=-1e9)
        t = jnp.pad(t, (0, pad), constant_values=0.0)
    p2 = p.reshape(n_blocks * block_rows, _LANES)
    t2 = t.reshape(n_blocks * block_rows, _LANES)

    partial = _dice_partial_sums(p2, t2, block_rows, n_blocks)
    sums = jnp.sum(partial, axis=0)              # (128,)
    inter, psum, tsum = sums[0], sums[1], sums[2]

    # Scalar epilogue (exactly mirrors the PyTorch forward).
    smooth = 1.0
    iou_loss = 1.0 - (2.0 * inter + smooth) / (psum + tsum + smooth)
    iou = 1.0 - iou_loss
    loss = jnp.float32(0.0)
    for th in _THRESHOLDS:
        loss = loss + jnp.maximum(th - iou * th, 0.0) * iou_loss
    loss = loss + 5.0 * jnp.maximum(0.5 - iou * 0.5, 0.0) * iou_loss
    return loss / 10.0


# ------------------------- pure-JAX reference (for checking) -------------------
def _reference_loss(prediction, target):
    p = jax.nn.sigmoid(prediction.reshape(-1).astype(jnp.float32))
    t = target.reshape(-1).astype(jnp.float32)
    smooth = 1.0
    inter = jnp.sum(p * t)
    iou_loss = 1.0 - (2.0 * inter + smooth) / (jnp.sum(p) + jnp.sum(t) + smooth)
    iou = 1.0 - iou_loss
    loss = 0.0
    for th in _THRESHOLDS:
        loss = loss + jnp.maximum(th - iou * th, 0.0) * iou_loss
    loss = loss + 5.0 * jnp.maximum(0.5 - iou * 0.5, 0.0) * iou_loss
    return loss / 10.0


if __name__ == "__main__":
    key = jax.random.PRNGKey(0)
    kp, kt = jax.random.split(key)
    # NCHW binary-segmentation style inputs: (batch=2, channels=4, 16, 16).
    pred = jax.random.normal(kp, (2, 4, 16, 16), dtype=jnp.float32)
    tgt = jax.random.bernoulli(kt, 0.5, (2, 4, 16, 16)).astype(jnp.float32)

    loss = jax.block_until_ready(map_loss2(pred, tgt))
    ref = jax.block_until_ready(_reference_loss(pred, tgt))
    assert jnp.isfinite(loss), loss
    assert jnp.allclose(loss, ref, atol=1e-5, rtol=1e-5), (loss, ref)
    print("KERNEL_OK")
</pallas_src>

<mosaic_0001>
module attributes {stable_mosaic.version = 11 : i64} {
  func.func @_dice_sums_kernel(%arg0: i32, %arg1: memref<16x128xf32, #tpu.memory_space<vmem>>, %arg2: memref<16x128xf32, #tpu.memory_space<vmem>>, %arg3: memref<1x128xf32, #tpu.memory_space<vmem>>) attributes {dimension_semantics = [#tpu.dimension_semantics<parallel>], iteration_bounds = array<i64: 1>, scalar_prefetch = 0 : i64, scratch_operands = 0 : i64, tpu.core_type = #tpu.core_type<tc>, window_params = [{transform_indices = @transform_0, window_bounds = array<i64: 16, 128>}, {transform_indices = @transform_1, window_bounds = array<i64: 16, 128>}, {transform_indices = @transform_2, window_bounds = array<i64: 1, 128>}]} {
    %c0 = arith.constant 0 : index
    %c0_0 = arith.constant 0 : index
    %0 = vector.load %arg1[%c0, %c0_0] : memref<16x128xf32, #tpu.memory_space<vmem>>, vector<16x128xf32>
    %c0_1 = arith.constant 0 : index
    %c0_2 = arith.constant 0 : index
    %1 = vector.load %arg2[%c0_1, %c0_2] : memref<16x128xf32, #tpu.memory_space<vmem>>, vector<16x128xf32>
    %2 = math.absf %0 : vector<16x128xf32>
    %cst = arith.constant 0.000000e+00 : f32
    %3 = vector.broadcast %cst : f32 to vector<16x128xf32>
    %4 = arith.subf %3, %2 : vector<16x128xf32>
    %5 = math.exp %4 : vector<16x128xf32>
    %cst_3 = arith.constant 0.000000e+00 : f32
    %6 = vector.broadcast %cst_3 : f32 to vector<16x128xf32>
    %7 = arith.cmpf oge, %0, %6 : vector<16x128xf32>
    %cst_4 = arith.constant 1.000000e+00 : f32
    %8 = vector.broadcast %cst_4 : f32 to vector<16x128xf32>
    %9 = arith.addf %8, %5 : vector<16x128xf32>
    %cst_5 = arith.constant 1.000000e+00 : f32
    %10 = vector.broadcast %cst_5 : f32 to vector<16x128xf32>
    %11 = arith.divf %10, %9 : vector<16x128xf32>
    %cst_6 = arith.constant 1.000000e+00 : f32
    %12 = vector.broadcast %cst_6 : f32 to vector<16x128xf32>
    %13 = arith.addf %12, %5 : vector<16x128xf32>
    %14 = arith.divf %5, %13 : vector<16x128xf32>
    %15 = arith.select %7, %11, %14 : vector<16x128xi1>, vector<16x128xf32>
    %16 = arith.mulf %15, %1 : vector<16x128xf32>
    %17 = vector.shape_cast %16 : vector<16x128xf32> to vector<1x16x128xf32>
    %cst_7 = arith.constant dense<0.000000e+00> : vector<1xf32>
    %18 = vector.multi_reduction <add>, %17, %cst_7 [1, 2] : vector<1x16x128xf32> to vector<1xf32>
    %19 = vector.shape_cast %18 : vector<1xf32> to vector<1x1x1xf32>
    %20 = vector.extract %19[0, 0, 0] : f32 from vector<1x1x1xf32>
    %21 = vector.shape_cast %15 : vector<16x128xf32> to vector<1x16x128xf32>
    %cst_8 = arith.constant dense<0.000000e+00> : vector<1xf32>
    %22 = vector.multi_reduction <add>, %21, %cst_8 [1, 2] : vector<1x16x128xf32> to vector<1xf32>
    %23 = vector.shape_cast %22 : vector<1xf32> to vector<1x1x1xf32>
    %24 = vector.extract %23[0, 0, 0] : f32 from vector<1x1x1xf32>
    %25 = vector.shape_cast %1 : vector<16x128xf32> to vector<1x16x128xf32>
    %cst_9 = arith.constant dense<0.000000e+00> : vector<1xf32>
    %26 = vector.multi_reduction <add>, %25, %cst_9 [1, 2] : vector<1x16x128xf32> to vector<1xf32>
    %27 = vector.shape_cast %26 : vector<1xf32> to vector<1x1x1xf32>
    %28 = vector.extract %27[0, 0, 0] : f32 from vector<1x1x1xf32>
    %29 = tpu.iota {dimensions = array<i32: 1>} : vector<1x128xi32>
    %c0_i32 = arith.constant 0 : i32
    %30 = vector.broadcast %c0_i32 : i32 to vector<1x128xi32>
    %31 = arith.cmpi eq, %29, %30 : vector<1x128xi32>
    %c1_i32 = arith.constant 1 : i32
    %32 = vector.broadcast %c1_i32 : i32 to vector<1x128xi32>
    %33 = arith.cmpi eq, %29, %32 : vector<1x128xi32>
    %c2_i32 = arith.constant 2 : i32
    %34 = vector.broadcast %c2_i32 : i32 to vector<1x128xi32>
    %35 = arith.cmpi eq, %29, %34 : vector<1x128xi32>
    %cst_10 = arith.constant 0.000000e+00 : f32
    %36 = vector.broadcast %28 : f32 to vector<1x128xf32>
    %37 = vector.broadcast %cst_10 : f32 to vector<1x128xf32>
    %38 = arith.select %35, %36, %37 : vector<1x128xi1>, vector<1x128xf32>
    %39 = vector.broadcast %24 : f32 to vector<1x128xf32>
    %40 = arith.select %33, %39, %38 : vector<1x128xi1>, vector<1x128xf32>
    %41 = vector.broadcast %20 : f32 to vector<1x128xf32>
    %42 = arith.select %31, %41, %40 : vector<1x128xi1>, vector<1x128xf32>
    %c0_11 = arith.constant 0 : index
    %c0_12 = arith.constant 0 : index
    %43 = vector.load %arg3[%c0_11, %c0_12] : memref<1x128xf32, #tpu.memory_space<vmem>>, vector<1x128xf32>
    tpu.vector_store %arg3[%c0_11, %c0_12], %42 {strides = array<i32>} : memref<1x128xf32, #tpu.memory_space<vmem>>, vector<1x128xf32>,
    return
  }
  func.func @transform_0(%arg0: i32) -> (i32, i32) {
    %c0_i32 = arith.constant 0 : i32
    %c0_i32_0 = arith.constant 0 : i32
    return %arg0, %c0_i32 : i32, i32
  }
  func.func @transform_1(%arg0: i32) -> (i32, i32) {
    %c0_i32 = arith.constant 0 : i32
    %c0_i32_0 = arith.constant 0 : i32
    return %arg0, %c0_i32 : i32, i32
  }
  func.func @transform_2(%arg0: i32) -> (i32, i32) {
    %c0_i32 = arith.constant 0 : i32
    %c0_i32_0 = arith.constant 0 : i32
    return %arg0, %c0_i32 : i32, i32
  }
}

</mosaic_0001>

<bundles_post_ra>
// kernel: map_loss2.1
= control target key start
LH: loop header
LB: loop body
LE: loop exit
PB: predicated region body
PF: predicated region fallthrough
CT: control target
= control target key end

     0   :  { %v67_v46 = vlaneseq  ;;  %s127_s1 = inlined_call_operand.vmem [shape: f32[16,128], index: 1, kind: input, shape index: {}]   ;;  %s128_s0 = inlined_call_operand.vmem [shape: f32[16,128], index: 0, kind: input, shape index: {}]   ;;  %s129_s2 = inlined_call_operand.vmem [shape: f32[1,128], index: 2, kind: output, shape index: {}]  }
   0x1   :  { %v13_v0 = vld [vmem:[%s127_s1] sm:$0xff]  ;;  %v14_v1 = vld [vmem:[%s127_s1 + $0x8] sm:$0xff] }
   0x2   :  { %v11_v2 = vld [vmem:[%s128_s0] sm:$0xff]  ;;  %v57_v3 = vadd.f32 %v14_v1, %v13_v0  ;;  %v12_v4 = vld [vmem:[%s128_s0 + $0x8] sm:$0xff]  ;;  %v68_v47 = vand.u32 127, %v67_v46 }
   0x3   :  { %v15_v5 = vand.u32 2147483647, %v11_v2  ;;  %v16_v6 = vand.u32 2147483647, %v12_v4  ;;  %vm23_vm0 = vcmp.ge.f32.partialorder %v11_v2, 0.0  ;;  %vm24_vm1 = vcmp.ge.f32.partialorder %v12_v4, 0.0 }
   0x4   :  { %58 = vadd.xlane.f32.xlu1 %v57_v3  ;;  %vm71_vm2 = vcmp.eq.s32.totalorder %v68_v47, 2  ;;  %vm70_vm3 = vcmp.eq.s32.totalorder %v68_v47, 1  ;;  %vm69_vm4 = vcmp.eq.s32.totalorder %v68_v47, 0 }
   0x5   :  { %v17_v7 = vsub.f32 0.0, %v15_v5  ;;  %v18_v8 = vsub.f32 0.0, %v16_v6 }
   0x7   :  { %v19_v9 = vmul.f32 1.442695, %v17_v7  ;;  %v21_v10 = vmul.f32 1.442695, %v18_v8 }
   0x9   :  { %89 = vpow2.f32 %v19_v9 }
   0xa   :  { %91 = vpow2.f32 %v21_v10 }
  0x13   :  { %v90_v11 = vpop.eup %89 }
  0x14   :  { %v92_v12 = vpop.eup %91  ;;  %v25_v13 = vadd.f32 1.0, %v90_v11 }
  0x15   :  { %v26_v14 = vadd.f32 1.0, %v92_v12 }
  0x16   :  { %93 = vrcp.f32 %v25_v13 }
  0x17   :  { %95 = vrcp.f32 %v26_v14 }
  0x20   :  { %v94_v15 = vpop.eup %93 }
  0x21   :  { %v96_v16 = vpop.eup %95  ;;  %v31_v17 = vmul.f32 %v94_v15, %v90_v11 }
  0x22   :  { %v32_v18 = vmul.f32 %v96_v16, %v92_v12 }
  0x23   :  { %v33_v19 = vsel %vm23_vm0, %v94_v15, %v31_v17 }
  0x24   :  { %v34_v20 = vsel %vm24_vm1, %v96_v16, %v32_v18  ;;  %v35_v21 = vmul.f32 %v33_v19, %v13_v0 }
  0x25   :  { %v36_v22 = vmul.f32 %v34_v20, %v14_v1  ;;  %v47_v24 = vadd.f32 %v34_v20, %v33_v19 }
  0x27   :  { %v37_v23 = vadd.f32 %v36_v22, %v35_v21 }
  0x29   :  { %38 = vadd.xlane.f32.xlu0 %v37_v23 }
  0x2d   :  { %48 = vadd.xlane.f32.xlu0 %v47_v24 }
  0x91   :  { %v59_v25 = vpop.xlane.xlu1 %58 }
  0x92   :  { %v60_v26 = vrot.slane %v59_v25, 4 }
  0x94   :  { %v61_v27 = vadd.f32 %v60_v26, %v59_v25 }
  0x96   :  { %v62_v31 = vrot.slane %v61_v27, 2 }
  0x98   :  { %v63_v37 = vadd.f32 %v62_v31, %v61_v27 }
  0x9a   :  { %v64_v42 = vrot.slane %v63_v37, 1 }
  0x9c   :  { %v65_v45 = vadd.f32 %v64_v42, %v63_v37 }
  0xb6   :  { %v39_v28 = vpop.xlane.xlu0 %38 }
  0xb7   :  { %v40_v29 = vrot.slane %v39_v28, 4 }
  0xb9   :  { %v41_v30 = vadd.f32 %v40_v29, %v39_v28 }
  0xba   :  { %v49_v32 = vpop.xlane.xlu0 %48 }
  0xbb   :  { %v42_v33 = vrot.slane %v41_v30, 2  ;;  %v50_v34 = vrot.slane %v49_v32, 4 }
  0xbd   :  { %v51_v35 = vadd.f32 %v50_v34, %v49_v32  ;;  %v43_v36 = vadd.f32 %v42_v33, %v41_v30 }
  0xbf   :  { %v52_v38 = vrot.slane %v51_v35, 2  ;;  %v44_v39 = vrot.slane %v43_v36, 1 }
  0xc1   :  { %v53_v40 = vadd.f32 %v52_v38, %v51_v35  ;;  %v45_v41 = vadd.f32 %v44_v39, %v43_v36 }
  0xc3   :  { %83 = vpush %v45_v41  ;;  %v54_v43 = vrot.slane %v53_v40, 1 }
  0xc5   :  { %v55_v44 = vadd.f32 %v54_v43, %v53_v40 }
  0xc7   :  { %85 = vpush %v55_v44 }
  0xc8   :  { %87 = vpush %v65_v45 }
  0xf4   :  { %s84_s0 = spop %83 }
  0xf5   :  { %v76_v51 = vstv %s84_s0 }
  0xf8   :  { %s86_s1 = spop %85 }
  0xf9   :  { %v74_v48 = vstv %s86_s1  ;;  %s88_s17 = spop %87 }
  0xfa   :  { %v72_v49 = vstv %s88_s17 }
  0xfb   :  { %v73_v50 = vsel %vm71_vm2, %v72_v49, 0.0 }
  0xfc   :  { %v75_v52 = vsel %vm70_vm3, %v74_v48, %v73_v50 }
  0xfd   :  { %v77_v53 = vsel %vm69_vm4, %v76_v51, %v75_v52 }
  0xfe   :  { %78 = vst [vmem:[%s129_s2] sm:$0x1] %v77_v53 }

</bundles_post_ra>
